<compile_context>
chip_gen: v5e
topology: v5e:2x2
jax: 0.10.0
libtpu: 0.0.40
codegen_flags: <defaults>
</compile_context>

<pallas_src>
import jax
import jax.numpy as jnp
from jax.experimental import pallas as pl
from jax.experimental.pallas import tpu as pltpu

IN_FEATURES = 187
HIDDEN1 = 100
HIDDEN2 = 50
OUT_FEATURES = 1
LANES = 128  # TPU lane width


def _round_up(n, m):
    return ((n + m - 1) // m) * m


def _mlp_kernel(x_ref, w1_ref, b1_ref, w2_ref, b2_ref, w3_ref, b3_ref, o_ref):
    # x: (TB, 187) -> h1: (TB, 100) -> h2: (TB, 50) -> out: (TB/128, 128)
    x = x_ref[...]

    h1 = jnp.dot(x, w1_ref[...], preferred_element_type=jnp.float32)
    h1 = jnp.maximum(h1 + b1_ref[...], 0.0)          # ReLU; b1 (1,100) broadcasts

    h2 = jnp.dot(h1, w2_ref[...], preferred_element_type=jnp.float32)
    h2 = jnp.maximum(h2 + b2_ref[...], 0.0)          # ReLU; b2 (1,50) broadcasts

    # Final Linear(50 -> 1): an MXU matmul with N=1 wastes 127/128 output
    # columns, so do it on the VPU/XLU instead: elementwise multiply by the w3
    # row then reduce over the lane axis.  Grouping TB rows as (TB/128, 128, 50)
    # is a tile-aligned leading-dim split (128 % 8 == 0) and yields the result
    # directly in lane-dense (TB/128, 128) form for a full-width store.
    tb, h = h2.shape
    h2r = h2.reshape(tb // LANES, LANES, h)                    # (TB/128, 128, 50)
    h3 = jnp.sum(h2r * w3_ref[...], axis=-1) + b3_ref[...]     # (TB/128, 128)
    o_ref[...] = jax.nn.sigmoid(h3)                            # lane-dense store


def ptbdb_classifier(x, params, *, block_rows=4096):
    """x: (B, 187) float32 -> (B, 1) float32."""
    # block_rows must keep the lane-dense output block (block_rows/128, 128)
    # 8-sublane aligned when the grid has more than one step.
    assert block_rows % (8 * LANES) == 0

    w1, b1, w2, b2, w3, b3 = params
    w3_row = w3.reshape(1, HIDDEN2)   # (50, 1) -> (1, 50) row for the VPU reduce
    b3 = b3.reshape(1, 1)

    B = x.shape[0]
    if B <= block_rows:
        tb = _round_up(max(B, 1), LANES)     # single grid step; block == array
    else:
        tb = block_rows
    b_pad = _round_up(B, tb)
    if b_pad != B:
        x = jnp.pad(x, ((0, b_pad - B), (0, 0)))

    grid = (b_pad // tb,)
    const = lambda a: pl.BlockSpec(a.shape, lambda i: (0,) * a.ndim)

    out = pl.pallas_call(
        _mlp_kernel,
        out_shape=jax.ShapeDtypeStruct((b_pad // LANES, LANES), jnp.float32),
        grid=grid,
        in_specs=[
            pl.BlockSpec((tb, IN_FEATURES), lambda i: (i, 0)),   # batch-tiled x
            const(w1), const(b1),                                # VMEM-resident
            const(w2), const(b2),
            const(w3_row), const(b3),
        ],
        out_specs=pl.BlockSpec((tb // LANES, LANES), lambda i: (i, 0)),
        compiler_params=pltpu.CompilerParams(
            dimension_semantics=("parallel",),        # shard batch across TCs
            vmem_limit_bytes=32 * 1024 * 1024,
        ),
    )(x, w1, b1, w2, b2, w3_row, b3)

    # Lane-dense slab -> (B, 1) column (row-major order is preserved).
    return out.reshape(b_pad, 1)[:B]


def init_params(key):
    """Mimics PyTorch nn.Linear default init: U[-1/sqrt(fan_in), 1/sqrt(fan_in)].
    Weights stored (in_features, out_features); biases (1, out_features)."""
    def linear(key, fan_in, fan_out):
        kw, kb = jax.random.split(key)
        bound = 1.0 / jnp.sqrt(fan_in)
        w = jax.random.uniform(kw, (fan_in, fan_out), jnp.float32, -bound, bound)
        b = jax.random.uniform(kb, (1, fan_out), jnp.float32, -bound, bound)
        return w, b

    k1, k2, k3 = jax.random.split(key, 3)
    w1, b1 = linear(k1, IN_FEATURES, HIDDEN1)
    w2, b2 = linear(k2, HIDDEN1, HIDDEN2)
    w3, b3 = linear(k3, HIDDEN2, OUT_FEATURES)
    return (w1, b1, w2, b2, w3, b3)


def _reference(x, params):
    w1, b1, w2, b2, w3, b3 = params
    h1 = jnp.maximum(x @ w1 + b1, 0.0)
    h2 = jnp.maximum(h1 @ w2 + b2, 0.0)
    return jax.nn.sigmoid(h2 @ w3 + b3)


if __name__ == "__main__":
    key = jax.random.PRNGKey(0)
    k_params, k_x1, k_x2 = jax.random.split(key, 3)
    params = init_params(k_params)

    # Small batch: single grid step, padded to one 128-row lane tile.
    x_small = jax.random.normal(k_x1, (8, IN_FEATURES), jnp.float32)
    out_small = jax.block_until_ready(ptbdb_classifier(x_small, params))
    ref_small = _reference(x_small, params)
    assert out_small.shape == (8, OUT_FEATURES)
    assert jnp.allclose(out_small, ref_small, atol=1e-5, rtol=1e-5)

    # Larger batch: exercises the batch grid (3 steps of 1024 rows), resident
    # weights across steps, and the tail padding / slice.
    x_big = jax.random.normal(k_x2, (2500, IN_FEATURES), jnp.float32)
    out_big = jax.block_until_ready(
        ptbdb_classifier(x_big, params, block_rows=1024))
    ref_big = _reference(x_big, params)
    assert out_big.shape == (2500, OUT_FEATURES)
    assert jnp.allclose(out_big, ref_big, atol=1e-5, rtol=1e-5)

    print("KERNEL_OK")
</pallas_src>

<mosaic_0001>
module attributes {stable_mosaic.version = 11 : i64} {
  func.func @_mlp_kernel(%arg0: i32, %arg1: memref<128x187xf32, #tpu.memory_space<vmem>>, %arg2: memref<187x100xf32, #tpu.memory_space<vmem>>, %arg3: memref<1x100xf32, #tpu.memory_space<vmem>>, %arg4: memref<100x50xf32, #tpu.memory_space<vmem>>, %arg5: memref<1x50xf32, #tpu.memory_space<vmem>>, %arg6: memref<1x50xf32, #tpu.memory_space<vmem>>, %arg7: memref<1x1xf32, #tpu.memory_space<vmem>>, %arg8: memref<1x128xf32, #tpu.memory_space<vmem>>) attributes {dimension_semantics = [#tpu.dimension_semantics<parallel>], iteration_bounds = array<i64: 1>, scalar_prefetch = 0 : i64, scratch_operands = 0 : i64, tpu.core_type = #tpu.core_type<tc>, window_params = [{transform_indices = @transform_0, window_bounds = array<i64: 128, 187>}, {pipeline_mode = #tpu.pipeline_mode<synchronous>, transform_indices = @transform_1, window_bounds = array<i64: 187, 100>}, {pipeline_mode = #tpu.pipeline_mode<synchronous>, transform_indices = @transform_2, window_bounds = array<i64: 1, 100>}, {pipeline_mode = #tpu.pipeline_mode<synchronous>, transform_indices = @transform_3, window_bounds = array<i64: 100, 50>}, {pipeline_mode = #tpu.pipeline_mode<synchronous>, transform_indices = @transform_4, window_bounds = array<i64: 1, 50>}, {pipeline_mode = #tpu.pipeline_mode<synchronous>, transform_indices = @transform_5, window_bounds = array<i64: 1, 50>}, {pipeline_mode = #tpu.pipeline_mode<synchronous>, transform_indices = @transform_6, window_bounds = array<i64: 1, 1>}, {transform_indices = @transform_7, window_bounds = array<i64: 1, 128>}]} {
    %c0 = arith.constant 0 : index
    %c0_0 = arith.constant 0 : index
    %0 = vector.load %arg1[%c0, %c0_0] : memref<128x187xf32, #tpu.memory_space<vmem>>, vector<128x187xf32>
    %c0_1 = arith.constant 0 : index
    %c0_2 = arith.constant 0 : index
    %1 = vector.load %arg2[%c0_1, %c0_2] : memref<187x100xf32, #tpu.memory_space<vmem>>, vector<187x100xf32>
    %cst = arith.constant dense<0.000000e+00> : vector<128x100xf32>
    %2 = tpu.matmul %0, %1, %cst {dimension_numbers = #tpu.dot_dimension_numbers<[1], [0], [0], [1], [0, 0, 1, 1], [], []>} : vector<128x187xf32>, vector<187x100xf32>, vector<128x100xf32> -> vector<128x100xf32>
    %c0_3 = arith.constant 0 : index
    %c0_4 = arith.constant 0 : index
    %3 = vector.load %arg3[%c0_3, %c0_4] : memref<1x100xf32, #tpu.memory_space<vmem>>, vector<1x100xf32>
    %4 = vector.broadcast %3 : vector<1x100xf32> to vector<128x100xf32>
    %5 = arith.addf %2, %4 : vector<128x100xf32>
    %cst_5 = arith.constant 0.000000e+00 : f32
    %6 = vector.broadcast %cst_5 : f32 to vector<128x100xf32>
    %7 = arith.maximumf %5, %6 : vector<128x100xf32>
    %c0_6 = arith.constant 0 : index
    %c0_7 = arith.constant 0 : index
    %8 = vector.load %arg4[%c0_6, %c0_7] : memref<100x50xf32, #tpu.memory_space<vmem>>, vector<100x50xf32>
    %cst_8 = arith.constant dense<0.000000e+00> : vector<128x50xf32>
    %9 = tpu.matmul %7, %8, %cst_8 {dimension_numbers = #tpu.dot_dimension_numbers<[1], [0], [0], [1], [0, 0, 1, 1], [], []>} : vector<128x100xf32>, vector<100x50xf32>, vector<128x50xf32> -> vector<128x50xf32>
    %c0_9 = arith.constant 0 : index
    %c0_10 = arith.constant 0 : index
    %10 = vector.load %arg5[%c0_9, %c0_10] : memref<1x50xf32, #tpu.memory_space<vmem>>, vector<1x50xf32>
    %11 = vector.broadcast %10 : vector<1x50xf32> to vector<128x50xf32>
    %12 = arith.addf %9, %11 : vector<128x50xf32>
    %cst_11 = arith.constant 0.000000e+00 : f32
    %13 = vector.broadcast %cst_11 : f32 to vector<128x50xf32>
    %14 = arith.maximumf %12, %13 : vector<128x50xf32>
    %15 = vector.shape_cast %14 : vector<128x50xf32> to vector<1x128x50xf32>
    %c0_12 = arith.constant 0 : index
    %c0_13 = arith.constant 0 : index
    %16 = vector.load %arg6[%c0_12, %c0_13] : memref<1x50xf32, #tpu.memory_space<vmem>>, vector<1x50xf32>
    %17 = vector.shape_cast %16 : vector<1x50xf32> to vector<1x1x50xf32>
    %18 = vector.broadcast %17 : vector<1x1x50xf32> to vector<1x128x50xf32>
    %19 = arith.mulf %15, %18 : vector<1x128x50xf32>
    %cst_14 = arith.constant dense<0.000000e+00> : vector<1x128xf32>
    %20 = vector.multi_reduction <add>, %19, %cst_14 [2] : vector<1x128x50xf32> to vector<1x128xf32>
    %c0_15 = arith.constant 0 : index
    %c0_16 = arith.constant 0 : index
    %21 = vector.load %arg7[%c0_15, %c0_16] : memref<1x1xf32, #tpu.memory_space<vmem>>, vector<1x1xf32>
    %22 = vector.broadcast %21 : vector<1x1xf32> to vector<1x128xf32>
    %23 = arith.addf %20, %22 : vector<1x128xf32>
    %24 = arith.negf %23 : vector<1x128xf32>
    %25 = math.exp %24 : vector<1x128xf32>
    %cst_17 = arith.constant 1.000000e+00 : f32
    %26 = vector.broadcast %cst_17 : f32 to vector<1x128xf32>
    %27 = arith.addf %26, %25 : vector<1x128xf32>
    %28 = arith.divf %26, %27 : vector<1x128xf32>
    %c0_18 = arith.constant 0 : index
    %c0_19 = arith.constant 0 : index
    %29 = vector.load %arg8[%c0_18, %c0_19] : memref<1x128xf32, #tpu.memory_space<vmem>>, vector<1x128xf32>
    tpu.vector_store %arg8[%c0_18, %c0_19], %28 {strides = array<i32>} : memref<1x128xf32, #tpu.memory_space<vmem>>, vector<1x128xf32>,
    return
  }
  func.func @transform_0(%arg0: i32) -> (i32, i32) {
    %c0_i32 = arith.constant 0 : i32
    %c0_i32_0 = arith.constant 0 : i32
    return %arg0, %c0_i32 : i32, i32
  }
  func.func @transform_1(%arg0: i32) -> (i32, i32) {
    %c0_i32 = arith.constant 0 : i32
    %c0_i32_0 = arith.constant 0 : i32
    %c0_i32_1 = arith.constant 0 : i32
    return %c0_i32, %c0_i32_0 : i32, i32
  }
  func.func @transform_2(%arg0: i32) -> (i32, i32) {
    %c0_i32 = arith.constant 0 : i32
    %c0_i32_0 = arith.constant 0 : i32
    %c0_i32_1 = arith.constant 0 : i32
    return %c0_i32, %c0_i32_0 : i32, i32
  }
  func.func @transform_3(%arg0: i32) -> (i32, i32) {
    %c0_i32 = arith.constant 0 : i32
    %c0_i32_0 = arith.constant 0 : i32
    %c0_i32_1 = arith.constant 0 : i32
    return %c0_i32, %c0_i32_0 : i32, i32
  }
  func.func @transform_4(%arg0: i32) -> (i32, i32) {
    %c0_i32 = arith.constant 0 : i32
    %c0_i32_0 = arith.constant 0 : i32
    %c0_i32_1 = arith.constant 0 : i32
    return %c0_i32, %c0_i32_0 : i32, i32
  }
  func.func @transform_5(%arg0: i32) -> (i32, i32) {
    %c0_i32 = arith.constant 0 : i32
    %c0_i32_0 = arith.constant 0 : i32
    %c0_i32_1 = arith.constant 0 : i32
    return %c0_i32, %c0_i32_0 : i32, i32
  }
  func.func @transform_6(%arg0: i32) -> (i32, i32) {
    %c0_i32 = arith.constant 0 : i32
    %c0_i32_0 = arith.constant 0 : i32
    %c0_i32_1 = arith.constant 0 : i32
    return %c0_i32, %c0_i32_0 : i32, i32
  }
  func.func @transform_7(%arg0: i32) -> (i32, i32) {
    %c0_i32 = arith.constant 0 : i32
    %c0_i32_0 = arith.constant 0 : i32
    return %arg0, %c0_i32 : i32, i32
  }
}

</mosaic_0001>

<bundles_post_ra>
// kernel: tpu_custom_call.1
= control target key start
LH: loop header
LB: loop body
LE: loop exit
PB: predicated region body
PF: predicated region fallthrough
CT: control target
= control target key end

     0   :  { %s1904_s0 = inlined_call_operand.vmem [shape: f32[128,187], index: 0, kind: input, shape index: {}]   ;;  %s1905_s1 = inlined_call_operand.vmem [shape: f32[187,100], index: 1, kind: input, shape index: {}]   ;;  %s1906_s2 = inlined_call_operand.vmem [shape: f32[1,100], index: 2, kind: input, shape index: {}]   ;;  %s1907_s3 = inlined_call_operand.vmem [shape: f32[100,50], index: 3, kind: input, shape index: {}]   ;;  %s1908_s4 = inlined_call_operand.vmem [shape: f32[1,50], index: 4, kind: input, shape index: {}]   ;;  %s1909_s5 = inlined_call_operand.vmem [shape: f32[1,50], index: 5, kind: input, shape index: {}]   ;;  %s1910_s6 = inlined_call_operand.<no memory space> [shape: f32[1,1], index: 6, kind: input, shape index: {}]   ;;  %s1911_s7 = inlined_call_operand.hbm [shape: f32[1,128], index: 7, kind: output, shape index: {}]  }
   0x1   :  { %v12_v0 = vstv %s1910_s6 }
   0x2   :  { %13 = vst [vmem:[#allocation2] sm:$0x1] %v12_v0 }
   0x3   :  { %v76_v1 = vld [vmem:[%s1905_s1 + $0x78] sm:$0xff]  ;;  %vm138_vm0 = vcmask 1042432   ;;  %v75_v3 = vld [vmem:[%s1905_s1 + $0x70] sm:$0xff]  ;;  %v74_v5 = vld [vmem:[%s1905_s1 + $0x68] sm:$0xff] }
   0x4   :  { %v84_v2 = vld [vmem:[%s1905_s1 + $0xb8] sm:$0x7]  ;;  %142 = vmatpush.msra.mxu0 %v76_v1  ;;  %v83_v4 = vld [vmem:[%s1905_s1 + $0xb0] sm:$0xff]  ;;  %v82_v6 = vld [vmem:[%s1905_s1 + $0xa8] sm:$0xff]  ;;  %982 = vmatpush.msra.mxu3 %v76_v1 }
   0x5   :  { %932 = vmatpush.msk.msra.mxu1 %vm138_vm0, %v84_v2  ;;  %v73_v7 = vld [vmem:[%s1905_s1 + $0x60] sm:$0xff]  ;;  %v72_v9 = vld [vmem:[%s1905_s1 + $0x58] sm:$0xff]  ;;  %v71_v11 = vld [vmem:[%s1905_s1 + $0x50] sm:$0xff] }
   0x6   :  { %143 = vmatpush.msra.mxu0 %v75_v3  ;;  %v81_v8 = vld [vmem:[%s1905_s1 + $0xa0] sm:$0xff]  ;;  %983 = vmatpush.msra.mxu3 %v75_v3  ;;  %v80_v10 = vld [vmem:[%s1905_s1 + $0x98] sm:$0xff]  ;;  %v79_v12 = vld [vmem:[%s1905_s1 + $0x90] sm:$0xff] }
   0x7   :  { %216 = vmatpush.msra.mxu1 %v83_v4  ;;  %v70_v13 = vld [vmem:[%s1905_s1 + $0x48] sm:$0xff] }
   0x8   :  { %144 = vmatpush.msra.mxu0 %v74_v5  ;;  %984 = vmatpush.msra.mxu3 %v74_v5  ;;  %v78_v14 = vld [vmem:[%s1905_s1 + $0x88] sm:$0xff] }
   0x9   :  { %217 = vmatpush.msra.mxu1 %v82_v6 }
   0xa   :  { %145 = vmatpush.msra.mxu0 %v73_v7  ;;  %985 = vmatpush.msra.mxu3 %v73_v7 }
   0xb   :  { %218 = vmatpush.msra.mxu1 %v81_v8 }
   0xc   :  { %146 = vmatpush.msra.mxu0 %v72_v9  ;;  %986 = vmatpush.msra.mxu3 %v72_v9 }
   0xd   :  { %219 = vmatpush.msra.mxu1 %v80_v10 }
   0xe   :  { %147 = vmatpush.msra.mxu0 %v71_v11 }
   0xf   :  { %220 = vmatpush.msra.mxu1 %v79_v12 }
  0x10   :  { %14 = vsyncpa [#allocation4], 0  ;;  %v69_v15 = vld [vmem:[%s1905_s1 + $0x40] sm:$0xff]  ;;  %987 = vmatpush.msra.mxu3 %v71_v11  ;;  %148 = vmatpush.msra.mxu0 %v70_v13  ;;  %v30_v17 = vld [vmem:[%s1904_s0 + $0x8] sm:$0xff]  ;;  %vm89_vm1 = vcmask 482304   ;;  %vm354_vm2 = vcmask 1043456  }
  0x11   :  { %v77_v16 = vld [vmem:[%s1905_s1 + $0x80] sm:$0xff]  ;;  %221 = vmatpush.msra.mxu1 %v78_v14  ;;  %v68_v18 = vld [vmem:[%s1905_s1 + $0x38] sm:$0xff]  ;;  %v67_v19 = vld [vmem:[%s1905_s1 + $0x30] sm:$0xff]  ;;  %vm305_vm3 = vcmask 818176   ;;  %vm459_vm4 = vcmask 408576   ;;  %vm856_vm10 = vcmask 130112  }
  0x12   :  { %988 = vmatpush.msra.mxu3 %v70_v13  ;;  %149 = vmatpush.msra.mxu0 %v69_v15  ;;  %v66_v20 = vld [vmem:[%s1905_s1 + $0x28] sm:$0xff]  ;;  %v65_v21 = vld [vmem:[%s1905_s1 + $0x20] sm:$0xff]  ;;  %v32_v22 = vld [vmem:[%s1904_s0 + $0x18] sm:$0xff]  ;;  %s923_s21 = sshll.u32 %s1911_s7, 4  ;;  %s924_s21 = int_to_ptr.hbm [resolvable:$true] %s923_s21 }
  0x13   :  { %222 = vmatpush.msra.mxu1 %v77_v16  ;;  %v64_v23 = vld [vmem:[%s1905_s1 + $0x18] sm:$0xff]  ;;  %v63_v24 = vld [vmem:[%s1905_s1 + $0x10] sm:$0xff]  ;;  %v62_v25 = vld [vmem:[%s1905_s1 + $0x8] sm:$0xff] }
  0x14   :  { %933 = vmatmul.msk.f32.vlgmr.msra.gmra.mxu1 %vm89_vm1, %v30_v17  ;;  %989 = vmatpush.msra.mxu3 %v69_v15  ;;  %v61_v26 = vld [vmem:[%s1905_s1] sm:$0xff]  ;;  %v34_v28 = vld [vmem:[%s1904_s0 + $0x28] sm:$0xff]  ;;  %v31_v29 = vld [vmem:[%s1904_s0 + $0x10] sm:$0xff] }
  0x15   :  { %150 = vmatpush.msra.mxu0 %v68_v18  ;;  %v29_v27 = vld [vmem:[%s1904_s0] sm:$0xff]  ;;  %v36_v30 = vld [vmem:[%s1904_s0 + $0x38] sm:$0xff]  ;;  %v38_v32 = vld [vmem:[%s1904_s0 + $0x48] sm:$0xff] }
  0x16   :  { %990 = vmatpush.msra.mxu3 %v68_v18  ;;  %v33_v31 = vld [vmem:[%s1904_s0 + $0x20] sm:$0xff]  ;;  %v35_v33 = vld [vmem:[%s1904_s0 + $0x30] sm:$0xff]  ;;  %v40_v34 = vld [vmem:[%s1904_s0 + $0x58] sm:$0xff] }
  0x17   :  { %151 = vmatpush.msra.mxu0 %v67_v19  ;;  %v37_v35 = vld [vmem:[%s1904_s0 + $0x40] sm:$0xff]  ;;  %v42_v36 = vld [vmem:[%s1904_s0 + $0x68] sm:$0xff]  ;;  %v39_v37 = vld [vmem:[%s1904_s0 + $0x50] sm:$0xff] }
  0x18   :  { %991 = vmatpush.msra.mxu3 %v67_v19  ;;  %v44_v38 = vld [vmem:[%s1904_s0 + $0x78] sm:$0xff]  ;;  %v53_v39 = vld [vmem:[%s1904_s0 + $0xc0] sm:$0xff]  ;;  %v46_v41 = vld [vmem:[%s1904_s0 + $0x88] sm:$0xff] }
  0x19   :  { %152 = vmatpush.msra.mxu0 %v66_v20  ;;  %v41_v40 = vld [vmem:[%s1904_s0 + $0x60] sm:$0xff]  ;;  %v55_v42 = vld [vmem:[%s1904_s0 + $0xd0] sm:$0xff]  ;;  %v48_v44 = vld [vmem:[%s1904_s0 + $0x98] sm:$0xff] }
  0x1a   :  { %992 = vmatpush.msra.mxu3 %v66_v20  ;;  %v43_v43 = vld [vmem:[%s1904_s0 + $0x70] sm:$0xff]  ;;  %v57_v45 = vld [vmem:[%s1904_s0 + $0xe0] sm:$0xff]  ;;  %v50_v47 = vld [vmem:[%s1904_s0 + $0xa8] sm:$0xff] }
  0x1b   :  { %153 = vmatpush.msra.mxu0 %v65_v21  ;;  %v45_v46 = vld [vmem:[%s1904_s0 + $0x80] sm:$0xff]  ;;  %v59_v48 = vld [vmem:[%s1904_s0 + $0xf0] sm:$0xff]  ;;  %v52_v50 = vld [vmem:[%s1904_s0 + $0xb8] sm:$0xff] }
  0x1c   :  { %934 = vmatmul.msk.f32.gmra.mxu1 %vm89_vm1, %v32_v22  ;;  %993 = vmatpush.msra.mxu3 %v65_v21  ;;  %v47_v49 = vld [vmem:[%s1904_s0 + $0x90] sm:$0xff]  ;;  %v300_v51 = vld [vmem:[%s1907_s3 + $0x60] sm:$0xf]  ;;  %v299_v52 = vld [vmem:[%s1907_s3 + $0x58] sm:$0xff] }
  0x1d   :  { %154 = vmatpush.msra.mxu0 %v64_v23  ;;  %949 = vmatpush.msk.msra.mxu2 %vm354_vm2, %v300_v51  ;;  %v49_v53 = vld [vmem:[%s1904_s0 + $0xa0] sm:$0xff]  ;;  %v54_v54 = vld [vmem:[%s1904_s0 + $0xc8] sm:$0xff]  ;;  %v298_v55 = vld [vmem:[%s1907_s3 + $0x50] sm:$0xff] }
  0x1e   :  { %994 = vmatpush.msra.mxu3 %v64_v23  ;;  %v297_v56 = vld [vmem:[%s1907_s3 + $0x48] sm:$0xff]  ;;  %v296_v57 = vld [vmem:[%s1907_s3 + $0x40] sm:$0xff]  ;;  %v295_v58 = vld [vmem:[%s1907_s3 + $0x38] sm:$0xff] }
  0x1f   :  { %155 = vmatpush.msra.mxu0 %v63_v24  ;;  %362 = vmatpush.msra.mxu2 %v299_v52  ;;  %v51_v59 = vld [vmem:[%s1904_s0 + $0xb0] sm:$0xff]  ;;  %v56_v60 = vld [vmem:[%s1904_s0 + $0xd8] sm:$0xff]  ;;  %v293_v62 = vld [vmem:[%s1907_s3 + $0x28] sm:$0xff] }
  0x20   :  { %995 = vmatpush.msra.mxu3 %v63_v24  ;;  %v294_v61 = vld [vmem:[%s1907_s3 + $0x30] sm:$0xff]  ;;  %v292_v63 = vld [vmem:[%s1907_s3 + $0x20] sm:$0xff]  ;;  %v291_v0 = vld [vmem:[%s1907_s3 + $0x18] sm:$0xff] }
  0x21   :  { %156 = vmatpush.msra.mxu0 %v62_v25  ;;  %363 = vmatpush.msra.mxu2 %v298_v55  ;;  %v58_v1 = vld [vmem:[%s1904_s0 + $0xe8] sm:$0xff]  ;;  %v290_v2 = vld [vmem:[%s1907_s3 + $0x10] sm:$0xff]  ;;  %v288_v4 = vld [vmem:[%s1907_s3] sm:$0xff] }
  0x22   :  { %996 = vmatpush.msra.mxu3 %v62_v25  ;;  %v289_v3 = vld [vmem:[%s1907_s3 + $0x8] sm:$0xff]  ;;  %v60_v5 = vld [vmem:[%s1904_s0 + $0xf8] sm:$0xff]  ;;  %v1378_v8 = vld [vmem:[%s1906_s2] ss:$0 sm:$0xff] }
  0x23   :  { %157 = vmatpush.msra.mxu0 %v61_v26  ;;  %364 = vmatpush.msra.mxu2 %v297_v56 }
  0x24   :  { %158 = vmatmul.f32.vlgmr.msra.gmra.mxu0 %v29_v27  ;;  %935 = vmatmul.msk.f32.gmra.mxu1 %vm89_vm1, %v34_v28 }
  0x25   :  { %997 = vmatpush.msra.mxu3 %v61_v26  ;;  %365 = vmatpush.msra.mxu2 %v296_v57 }
  0x26   :  { %194 = vmatmul.f32.vlgmr.msra.gmra.mxu3 %v53_v39 }
  0x27   :  { %998 = vmatpush.msk.msrb.mxu3 %vm354_vm2, %v300_v51  ;;  %366 = vmatpush.msra.mxu2 %v295_v58 }
  0x29   :  { %999 = vmatpush.msrb.mxu3 %v299_v52  ;;  %367 = vmatpush.msra.mxu2 %v294_v61 }
  0x2b   :  { %1000 = vmatpush.msrb.mxu3 %v298_v55  ;;  %368 = vmatpush.msra.mxu2 %v293_v62  ;;  %v508_v55 = vld [vmem:[#allocation2] sm:$0x1] }
  0x2c   :  { %161 = vmatmul.f32.gmra.mxu0 %v31_v29  ;;  %936 = vmatmul.msk.f32.gmra.mxu1 %vm89_vm1, %v36_v30 }
  0x2d   :  { %1001 = vmatpush.msrb.mxu3 %v297_v56  ;;  %369 = vmatpush.msra.mxu2 %v292_v63  ;;  %v1107_v56 = vmov 0  }
  0x2e   :  { %197 = vmatmul.f32.gmra.mxu3 %v55_v42  ;;  %1013 = vset.pattern.permute.xlu0 %v1107_v56 }
  0x2f   :  { %1002 = vmatpush.msrb.mxu3 %v296_v57  ;;  %370 = vmatpush.msra.mxu2 %v291_v0 }
  0x30   :  { %511 = vperm.xlu0 %1013, %v508_v55  }
  0x31   :  { %1003 = vmatpush.msrb.mxu3 %v295_v58  ;;  %371 = vmatpush.msra.mxu2 %v290_v2 }
  0x33   :  { %1004 = vmatpush.msrb.mxu3 %v294_v61  ;;  %372 = vmatpush.msra.mxu2 %v289_v3 }
  0x34   :  { %164 = vmatmul.f32.gmra.mxu0 %v33_v31  ;;  %937 = vmatmul.msk.f32.gmra.mxu1 %vm89_vm1, %v38_v32 }
  0x35   :  { %1005 = vmatpush.msrb.mxu3 %v293_v62  ;;  %373 = vmatpush.msra.mxu2 %v288_v4 }
  0x36   :  { %200 = vmatmul.f32.gmra.mxu3 %v57_v45 }
  0x37   :  { %1006 = vmatpush.msrb.mxu3 %v292_v63 }
  0x39   :  { %1007 = vmatpush.msrb.mxu3 %v291_v0 }
  0x3b   :  { %1008 = vmatpush.msrb.mxu3 %v290_v2 }
  0x3c   :  { %167 = vmatmul.f32.gmra.mxu0 %v35_v33  ;;  %938 = vmatmul.msk.f32.gmra.mxu1 %vm89_vm1, %v40_v34 }
  0x3d   :  { %1009 = vmatpush.msrb.mxu3 %v289_v3 }
  0x3e   :  { %203 = vmatmul.f32.gmra.mxu3 %v59_v48 }
  0x3f   :  { %1010 = vmatpush.msrb.mxu3 %v288_v4 }
  0x44   :  { %170 = vmatmul.f32.gmra.mxu0 %v37_v35  ;;  %939 = vmatmul.msk.f32.gmra.mxu1 %vm89_vm1, %v42_v36 }
  0x4c   :  { %173 = vmatmul.f32.gmra.mxu0 %v39_v37  ;;  %940 = vmatmul.msk.f32.gmra.mxu1 %vm89_vm1, %v44_v38 }
  0x54   :  { %176 = vmatmul.f32.gmra.mxu0 %v41_v40  ;;  %941 = vmatmul.msk.f32.gmra.mxu1 %vm89_vm1, %v46_v41 }
  0x5c   :  { %179 = vmatmul.f32.gmra.mxu0 %v43_v43  ;;  %942 = vmatmul.msk.f32.gmra.mxu1 %vm89_vm1, %v48_v44 }
  0x64   :  { %182 = vmatmul.f32.gmra.mxu0 %v45_v46  ;;  %943 = vmatmul.msk.f32.gmra.mxu1 %vm89_vm1, %v50_v47 }
  0x6c   :  { %185 = vmatmul.f32.gmra.mxu0 %v47_v49  ;;  %944 = vmatmul.msk.f32.gmra.mxu1 %vm89_vm1, %v52_v50 }
  0x74   :  { %188 = vmatmul.f32.gmra.mxu0 %v49_v53  ;;  %945 = vmatmul.msk.f32.gmra.mxu1 %vm89_vm1, %v54_v54 }
  0x7c   :  { %191 = vmatmul.f32.gmra.mxu0 %v51_v59  ;;  %946 = vmatmul.msk.f32.gmra.mxu1 %vm89_vm1, %v56_v60 }
  0x84   :  { %947 = vmatmul.msk.f32.gmra.mxu1 %vm89_vm1, %v58_v1 }
  0x8c   :  { %948 = vmatmul.msk.f32.gmra.mxu1 %vm89_vm1, %v60_v5 }
  0x91   :  { %v224_v6 = vpop.f32.mrf.mxu1 }
  0x99   :  { %v227_v7 = vpop.f32.mrf.mxu1 }
  0xa1   :  { %v159_v9 = vpop.f32.mrf.mxu0  ;;  %v230_v10 = vpop.f32.mrf.mxu1 }
  0xa2   :  { %v160_v11 = vadd.f32 %v1378_v8, %v159_v9 }
  0xa4   :  { %v225_v12 = vadd.f32 %v224_v6, %v160_v11 }
  0xa6   :  { %v272_v13 = vmax.f32 %v225_v12, 0.0 }
  0xa8   :  { %950 = vmatmul.msk.f32.vlgmr.msra.gmra.mxu2 %vm305_vm3, %v272_v13 }
  0xa9   :  { %v162_v14 = vpop.f32.mrf.mxu0  ;;  %v233_v15 = vpop.f32.mrf.mxu1 }
  0xaa   :  { %v163_v16 = vadd.f32 %v1378_v8, %v162_v14  ;;  %v195_v53 = vpop.f32.mrf.mxu3 }
  0xab   :  { %v196_v62 = vadd.f32 %v1378_v8, %v195_v53 }
  0xac   :  { %v228_v17 = vadd.f32 %v227_v7, %v163_v16 }
  0xae   :  { %v273_v18 = vmax.f32 %v228_v17, 0.0 }
  0xb0   :  { %951 = vmatmul.msk.f32.gmra.mxu2 %vm305_vm3, %v273_v18 }
  0xb1   :  { %v165_v19 = vpop.f32.mrf.mxu0  ;;  %v236_v20 = vpop.f32.mrf.mxu1 }
  0xb2   :  { %v166_v21 = vadd.f32 %v1378_v8, %v165_v19  ;;  %v198_v63 = vpop.f32.mrf.mxu3 }
  0xb3   :  { %v199_v7 = vadd.f32 %v1378_v8, %v198_v63 }
  0xb4   :  { %v231_v22 = vadd.f32 %v230_v10, %v166_v21 }
  0xb6   :  { %v274_v23 = vmax.f32 %v231_v22, 0.0 }
  0xb8   :  { %952 = vmatmul.msk.f32.gmra.mxu2 %vm305_vm3, %v274_v23 }
  0xb9   :  { %v168_v24 = vpop.f32.mrf.mxu0  ;;  %v239_v25 = vpop.f32.mrf.mxu1 }
  0xba   :  { %v169_v26 = vadd.f32 %v1378_v8, %v168_v24  ;;  %v201_v9 = vpop.f32.mrf.mxu3 }
  0xbb   :  { %v202_v17 = vadd.f32 %v1378_v8, %v201_v9 }
  0xbc   :  { %v234_v27 = vadd.f32 %v233_v15, %v169_v26  ;;  %v1415_v26 = vld [vmem:[%s1908_s4] ss:$0 sm:$0xff]  ;;  %s1108_s4 = smov [#allocation3]  }
  0xbe   :  { %v275_v28 = vmax.f32 %v234_v27, 0.0 }
  0xc0   :  { %953 = vmatmul.msk.f32.gmra.mxu2 %vm305_vm3, %v275_v28 }
  0xc1   :  { %v171_v29 = vpop.f32.mrf.mxu0  ;;  %v242_v30 = vpop.f32.mrf.mxu1 }
  0xc2   :  { %v172_v31 = vadd.f32 %v1378_v8, %v171_v29  ;;  %v1421_v29 = vld [vmem:[%s1909_s5] ss:$0 sm:$0xff]  ;;  %s921_s5 = sshll.u32 %s1108_s4, 4  ;;  %s922_s5 = int_to_ptr.vmem [resolvable:$true] %s921_s5 }
  0xc4   :  { %v237_v32 = vadd.f32 %v236_v20, %v172_v31  ;;  %v204_v20 = vpop.f32.mrf.mxu3 }
  0xc5   :  { %v205_v22 = vadd.f32 %v1378_v8, %v204_v20 }
  0xc6   :  { %v276_v33 = vmax.f32 %v237_v32, 0.0 }
  0xc8   :  { %954 = vmatmul.msk.f32.gmra.mxu2 %vm305_vm3, %v276_v33 }
  0xc9   :  { %v174_v34 = vpop.f32.mrf.mxu0  ;;  %v245_v35 = vpop.f32.mrf.mxu1 }
  0xca   :  { %v175_v36 = vadd.f32 %v1378_v8, %v174_v34 }
  0xcc   :  { %v240_v37 = vadd.f32 %v239_v25, %v175_v36 }
  0xce   :  { %v277_v38 = vmax.f32 %v240_v37, 0.0 }
  0xd0   :  { %955 = vmatmul.msk.f32.gmra.mxu2 %vm305_vm3, %v277_v38 }
  0xd1   :  { %v177_v39 = vpop.f32.mrf.mxu0  ;;  %v248_v40 = vpop.f32.mrf.mxu1 }
  0xd2   :  { %v178_v41 = vadd.f32 %v1378_v8, %v177_v39 }
  0xd4   :  { %v243_v42 = vadd.f32 %v242_v30, %v178_v41 }
  0xd6   :  { %v278_v43 = vmax.f32 %v243_v42, 0.0 }
  0xd8   :  { %956 = vmatmul.msk.f32.gmra.mxu2 %vm305_vm3, %v278_v43 }
  0xd9   :  { %v180_v44 = vpop.f32.mrf.mxu0  ;;  %v251_v45 = vpop.f32.mrf.mxu1 }
  0xda   :  { %v181_v46 = vadd.f32 %v1378_v8, %v180_v44 }
  0xdc   :  { %v246_v47 = vadd.f32 %v245_v35, %v181_v46 }
  0xde   :  { %v279_v48 = vmax.f32 %v246_v47, 0.0 }
  0xe0   :  { %957 = vmatmul.msk.f32.gmra.mxu2 %vm305_vm3, %v279_v48 }
  0xe1   :  { %v183_v49 = vpop.f32.mrf.mxu0  ;;  %v254_v50 = vpop.f32.mrf.mxu1 }
  0xe2   :  { %v184_v51 = vadd.f32 %v1378_v8, %v183_v49 }
  0xe4   :  { %v249_v52 = vadd.f32 %v248_v40, %v184_v51 }
  0xe6   :  { %v280_v54 = vmax.f32 %v249_v52, 0.0 }
  0xe8   :  { %958 = vmatmul.msk.f32.gmra.mxu2 %vm305_vm3, %v280_v54 }
  0xe9   :  { %v186_v57 = vpop.f32.mrf.mxu0  ;;  %v257_v58 = vpop.f32.mrf.mxu1 }
  0xea   :  { %v187_v59 = vadd.f32 %v1378_v8, %v186_v57 }
  0xec   :  { %v252_v60 = vadd.f32 %v251_v45, %v187_v59 }
  0xee   :  { %v281_v61 = vmax.f32 %v252_v60, 0.0 }
  0xf0   :  { %959 = vmatmul.msk.f32.gmra.mxu2 %vm305_vm3, %v281_v61 }
  0xf1   :  { %v189_v0 = vpop.f32.mrf.mxu0  ;;  %v260_v1 = vpop.f32.mrf.mxu1 }
  0xf2   :  { %v190_v2 = vadd.f32 %v1378_v8, %v189_v0  ;;  %v261_v3 = vadd.f32 %v260_v1, %v196_v62 }
  0xf4   :  { %v255_v4 = vadd.f32 %v254_v50, %v190_v2  ;;  %v284_v5 = vmax.f32 %v261_v3, 0.0 }
  0xf6   :  { %v282_v6 = vmax.f32 %v255_v4, 0.0  ;;  %962 = vmatmul.msk.f32.vlgmr.msrb.gmra.mxu3 %vm305_vm3, %v284_v5 }
  0xf8   :  { %960 = vmatmul.msk.f32.gmra.mxu2 %vm305_vm3, %v282_v6 }
  0xf9   :  { %v192_v10 = vpop.f32.mrf.mxu0  ;;  %v263_v11 = vpop.f32.mrf.mxu1 }
  0xfa   :  { %v193_v12 = vadd.f32 %v1378_v8, %v192_v10  ;;  %v264_v13 = vadd.f32 %v263_v11, %v199_v7 }
  0xfc   :  { %v258_v14 = vadd.f32 %v257_v58, %v193_v12  ;;  %v285_v15 = vmax.f32 %v264_v13, 0.0 }
  0xfe   :  { %v283_v16 = vmax.f32 %v258_v14, 0.0  ;;  %963 = vmatmul.msk.f32.gmra.mxu3 %vm305_vm3, %v285_v15 }
 0x100   :  { %961 = vmatmul.msk.f32.gmra.mxu2 %vm305_vm3, %v283_v16 }
 0x101   :  { %v266_v18 = vpop.f32.mrf.mxu1 }
 0x102   :  { %v267_v19 = vadd.f32 %v266_v18, %v202_v17 }
 0x104   :  { %v286_v21 = vmax.f32 %v267_v19, 0.0 }
 0x106   :  { %964 = vmatmul.msk.f32.gmra.mxu3 %vm305_vm3, %v286_v21 }
 0x109   :  { %v269_v23 = vpop.f32.mrf.mxu1 }
 0x10a   :  { %v270_v24 = vadd.f32 %v269_v23, %v205_v22 }
 0x10c   :  { %v287_v25 = vmax.f32 %v270_v24, 0.0 }
 0x10e   :  { %965 = vmatmul.msk.f32.gmra.mxu3 %vm305_vm3, %v287_v25  ;;  %vm860_vm3 = vcmask 195712  }
 0x12b   :  { %v375_v27 = vpop.f32.mrf.mxu2 }
 0x12c   :  { %v376_v28 = vadd.f32 %v1415_v26, %v375_v27 }
 0x12e   :  { %v423_v30 = vmax.f32 %v376_v28, 0.0 }
 0x130   :  { %v443_v8 = vmul.f32 %v1421_v29, %v423_v30 }
 0x132   :  { %v460_v31 = vsel %vm459_vm4, %v443_v8, 0.0 }
 0x133   :  { %v378_v32 = vpop.f32.mrf.mxu2  ;;  %461 = vadd.xlane.f32.xlu0 %v460_v31 }
 0x134   :  { %v379_v33 = vadd.f32 %v1415_v26, %v378_v32 }
 0x136   :  { %v424_v34 = vmax.f32 %v379_v33, 0.0 }
 0x138   :  { %v444_v35 = vmul.f32 %v1421_v29, %v424_v34 }
 0x13a   :  { %v463_v36 = vsel %vm459_vm4, %v444_v35, 0.0 }
 0x13b   :  { %v381_v37 = vpop.f32.mrf.mxu2  ;;  %464 = vadd.xlane.f32.xlu1 %v463_v36 }
 0x13c   :  { %v382_v38 = vadd.f32 %v1415_v26, %v381_v37 }
 0x13e   :  { %v425_v39 = vmax.f32 %v382_v38, 0.0 }
 0x140   :  { %v445_v40 = vmul.f32 %v1421_v29, %v425_v39 }
 0x142   :  { %v466_v41 = vsel %vm459_vm4, %v445_v40, 0.0 }
 0x143   :  { %v384_v42 = vpop.f32.mrf.mxu2  ;;  %467 = vadd.xlane.f32.xlu1 %v466_v41 }
 0x144   :  { %v385_v43 = vadd.f32 %v1415_v26, %v384_v42 }
 0x146   :  { %v426_v44 = vmax.f32 %v385_v43, 0.0 }
 0x148   :  { %v446_v45 = vmul.f32 %v1421_v29, %v426_v44 }
 0x14a   :  { %v469_v46 = vsel %vm459_vm4, %v446_v45, 0.0  ;;  %v512_v45 = vpop.permute.xlu0 %511 }
 0x14b   :  { %v387_v47 = vpop.f32.mrf.mxu2  ;;  %470 = vadd.xlane.f32.xlu2 %v469_v46  ;;  %v1470_v46 = vperm.slane %v512_v45, 0 }
 0x14c   :  { %v388_v48 = vadd.f32 %v1415_v26, %v387_v47 }
 0x14e   :  { %v427_v49 = vmax.f32 %v388_v48, 0.0 }
 0x150   :  { %v447_v50 = vmul.f32 %v1421_v29, %v427_v49 }
 0x152   :  { %v472_v51 = vsel %vm459_vm4, %v447_v50, 0.0 }
 0x153   :  { %v390_v52 = vpop.f32.mrf.mxu2  ;;  %473 = vadd.xlane.f32.xlu2 %v472_v51 }
 0x154   :  { %v391_v53 = vadd.f32 %v1415_v26, %v390_v52 }
 0x156   :  { %v428_v54 = vmax.f32 %v391_v53, 0.0 }
 0x158   :  { %v448_v55 = vmul.f32 %v1421_v29, %v428_v54 }
 0x15a   :  { %v475_v56 = vsel %vm459_vm4, %v448_v55, 0.0 }
 0x15b   :  { %v393_v57 = vpop.f32.mrf.mxu2  ;;  %476 = vadd.xlane.f32.xlu1 %v475_v56 }
 0x15c   :  { %v394_v58 = vadd.f32 %v1415_v26, %v393_v57 }
 0x15e   :  { %v429_v59 = vmax.f32 %v394_v58, 0.0 }
 0x160   :  { %v449_v60 = vmul.f32 %v1421_v29, %v429_v59 }
 0x162   :  { %v478_v61 = vsel %vm459_vm4, %v449_v60, 0.0 }
 0x163   :  { %v396_v62 = vpop.f32.mrf.mxu2  ;;  %479 = vadd.xlane.f32.xlu2 %v478_v61 }
 0x164   :  { %v397_v63 = vadd.f32 %v1415_v26, %v396_v62 }
 0x166   :  { %v430_v0 = vmax.f32 %v397_v63, 0.0 }
 0x168   :  { %v450_v1 = vmul.f32 %v1421_v29, %v430_v0 }
 0x16a   :  { %v481_v2 = vsel %vm459_vm4, %v450_v1, 0.0 }
 0x16b   :  { %v399_v3 = vpop.f32.mrf.mxu2  ;;  %482 = vadd.xlane.f32.xlu1 %v481_v2 }
 0x16c   :  { %v400_v4 = vadd.f32 %v1415_v26, %v399_v3 }
 0x16e   :  { %v431_v5 = vmax.f32 %v400_v4, 0.0 }
 0x170   :  { %v451_v6 = vmul.f32 %v1421_v29, %v431_v5 }
 0x172   :  { %v484_v7 = vsel %vm459_vm4, %v451_v6, 0.0 }
 0x173   :  { %v402_v9 = vpop.f32.mrf.mxu2  ;;  %485 = vadd.xlane.f32.xlu2 %v484_v7 }
 0x174   :  { %v403_v10 = vadd.f32 %v1415_v26, %v402_v9 }
 0x176   :  { %v432_v11 = vmax.f32 %v403_v10, 0.0 }
 0x178   :  { %v452_v12 = vmul.f32 %v1421_v29, %v432_v11 }
 0x179   :  { %v411_v13 = vpop.f32.mrf.mxu3 }
 0x17a   :  { %v412_v14 = vadd.f32 %v1415_v26, %v411_v13  ;;  %v487_v15 = vsel %vm459_vm4, %v452_v12, 0.0 }
 0x17b   :  { %v405_v16 = vpop.f32.mrf.mxu2  ;;  %488 = vadd.xlane.f32.xlu1 %v487_v15 }
 0x17c   :  { %v435_v17 = vmax.f32 %v412_v14, 0.0  ;;  %v406_v18 = vadd.f32 %v1415_v26, %v405_v16 }
 0x17e   :  { %v455_v19 = vmul.f32 %v1421_v29, %v435_v17  ;;  %v433_v20 = vmax.f32 %v406_v18, 0.0 }
 0x180   :  { %v496_v21 = vsel %vm459_vm4, %v455_v19, 0.0  ;;  %v453_v25 = vmul.f32 %v1421_v29, %v433_v20 }
 0x181   :  { %v414_v22 = vpop.f32.mrf.mxu3  ;;  %497 = vadd.xlane.f32.xlu2 %v496_v21 }
 0x182   :  { %v415_v27 = vadd.f32 %v1415_v26, %v414_v22  ;;  %v490_v30 = vsel %vm459_vm4, %v453_v25, 0.0 }
 0x183   :  { %v408_v23 = vpop.f32.mrf.mxu2 }
 0x184   :  { %v409_v24 = vadd.f32 %v1415_v26, %v408_v23  ;;  %v436_v32 = vmax.f32 %v415_v27, 0.0 }
 0x186   :  { %v434_v28 = vmax.f32 %v409_v24, 0.0  ;;  %v456_v37 = vmul.f32 %v1421_v29, %v436_v32  ;;  %v851_v24 = vlaneseq }
 0x188   :  { %v454_v8 = vmul.f32 %v1421_v29, %v434_v28  ;;  %v499_v41 = vsel %vm459_vm4, %v456_v37, 0.0  ;;  %v1513_v32 = vand.u32 127, %v851_v24 }
 0x189   :  { %v417_v31 = vpop.f32.mrf.mxu3  ;;  %491 = vadd.xlane.f32.xlu2 %v490_v30 }
 0x18a   :  { %v418_v33 = vadd.f32 %v1415_v26, %v417_v31  ;;  %v493_v34 = vsel %vm459_vm4, %v454_v8, 0.0 }
 0x18b   :  { %494 = vadd.xlane.f32.xlu1 %v493_v34 }
 0x18c   :  { %v437_v35 = vmax.f32 %v418_v33, 0.0 }
 0x18e   :  { %v457_v36 = vmul.f32 %v1421_v29, %v437_v35 }
 0x190   :  { %v502_v38 = vsel %vm459_vm4, %v457_v36, 0.0 }
 0x191   :  { %v420_v39 = vpop.f32.mrf.mxu3  ;;  %503 = vadd.xlane.f32.xlu2 %v502_v38 }
 0x192   :  { %v421_v40 = vadd.f32 %v1415_v26, %v420_v39 }
 0x193   :  { %500 = vadd.xlane.f32.xlu1 %v499_v41 }
 0x194   :  { %v438_v42 = vmax.f32 %v421_v40, 0.0 }
 0x196   :  { %v458_v43 = vmul.f32 %v1421_v29, %v438_v42 }
 0x198   :  { %v505_v44 = vsel %vm459_vm4, %v458_v43, 0.0 }
 0x199   :  { %506 = vadd.xlane.f32.xlu0 %v505_v44 }
 0x1a6   :  { %v462_v47 = vpop.xlane.xlu0 %461 }
 0x1a7   :  { %v515_v49 = vadd.f32 %v1470_v46, %v462_v47 }
 0x1a9   :  { %v966_v51 = vmul.f32 -1.442695, %v515_v49  ;;  %v854_v49 = vadd.s32 4294967288, %v1513_v32 }
 0x1ab   :  { %1017 = vpow2.f32 %v966_v51 }
 0x1ae   :  { %v465_v48 = vpop.xlane.xlu1 %464 }
 0x1af   :  { %v516_v50 = vadd.f32 %v1470_v46, %v465_v48 }
 0x1b1   :  { %v967_v52 = vmul.f32 -1.442695, %v516_v50  ;;  %v1018_v54 = vpop.eup %1017 }
 0x1b2   :  { %v1476_v59 = vadd.f32 1.0, %v1018_v54 }
 0x1b3   :  { %1019 = vpow2.f32 %v967_v52 }
 0x1b4   :  { %vm600_vm5 = vweird.f32 %v1476_v59  ;;  %v606_v37 = vand.u32 2147483648, %v1476_v59  ;;  %v604_v45 = vand.u32 2147483647, %v1476_v59 }
 0x1b6   :  { %v468_v53 = vpop.xlane.xlu1 %467  ;;  %vm605_vm12 = vcmp.eq.f32.partialorder %v604_v45, 8.507059e+37 }
 0x1b7   :  { %v517_v29 = vadd.f32 %v1470_v46, %v468_v53 }
 0x1b9   :  { %v968_v57 = vmul.f32 -1.442695, %v517_v29  ;;  %v1020_v58 = vpop.eup %1019  ;;  %v607_v29 = vor.u32 1.1754944e-38, %v606_v37 }
 0x1ba   :  { %v1479_v62 = vadd.f32 1.0, %v1020_v58  ;;  %v1559_v58 = vadd.s32 4294967280, %v1513_v32 }
 0x1bb   :  { %1021 = vpow2.f32 %v968_v57 }
 0x1bc   :  { %1023 = vrcp.f32 %v1476_v59  ;;  %v621_v47 = vand.u32 2147483648, %v1479_v62  ;;  %vm615_vm9 = vweird.f32 %v1479_v62  ;;  %v619_v50 = vand.u32 2147483647, %v1479_v62 }
 0x1be   :  { %v471_v26 = vpop.xlane.xlu2 %470  ;;  %v622_v57 = vor.u32 1.1754944e-38, %v621_v47  ;;  %vm620_vm13 = vcmp.eq.f32.partialorder %v619_v50, 8.507059e+37 }
 0x1bf   :  { %v518_v55 = vadd.f32 %v1470_v46, %v471_v26 }
 0x1c1   :  { %v969_v61 = vmul.f32 -1.442695, %v518_v55  ;;  %v1022_v2 = vpop.eup %1021 }
 0x1c2   :  { %v1484_v4 = vpop.eup %1023  ;;  %v1486_v7 = vadd.f32 1.0, %v1022_v2 }
 0x1c3   :  { %1025 = vpow2.f32 %v969_v61  ;;  %v596_v12 = vmul.f32 %v1484_v4, %v1476_v59  ;;  %vm601_vm6 = vweird.f32 %v1484_v4  ;;  %v1562_v59 = vadd.s32 4294967272, %v1513_v32 }
 0x1c4   :  { %1027 = vrcp.f32 %v1479_v62  ;;  %vm1529_vm8 = vmor %vm600_vm5, %vm601_vm6  ;;  %vm630_vm15 = vweird.f32 %v1486_v7  ;;  %vm864_vm5 = vcmask 261312  }
 0x1c5   :  { %v597_v18 = vsub.f32 1.0, %v596_v12 }
 0x1c6   :  { %v474_v56 = vpop.xlane.xlu2 %473 }
 0x1c7   :  { %v519_v60 = vadd.f32 %v1470_v46, %v474_v56  ;;  %v598_v25 = vmul.f32 %v1484_v4, %v597_v18 }
 0x1c9   :  { %v970_v0 = vmul.f32 -1.442695, %v519_v60  ;;  %v1026_v6 = vpop.eup %1025  ;;  %v599_v34 = vadd.f32 %v1484_v4, %v598_v25 }
 0x1ca   :  { %v1489_v10 = vpop.eup %1027  ;;  %v1493_v13 = vadd.f32 1.0, %v1026_v6 }
 0x1cb   :  { %1029 = vpow2.f32 %v970_v0  ;;  %v611_v15 = vmul.f32 %v1489_v10, %v1479_v62  ;;  %vm616_vm7 = vweird.f32 %v1489_v10  ;;  %v603_v48 = vsel %vm1529_vm8, %v1484_v4, %v599_v34 }
 0x1cc   :  { %vm1543_vm11 = vmor %vm615_vm9, %vm616_vm7  ;;  %v608_v61 = vsel %vm605_vm12, %v607_v29, %v603_v48  ;;  %v634_v62 = vand.u32 2147483647, %v1486_v7  ;;  %vm645_vm4 = vweird.f32 %v1493_v13  ;;  %vm868_vm12 = vcmask 326912  }
 0x1cd   :  { %v612_v21 = vsub.f32 1.0, %v611_v15  ;;  %v649_v15 = vand.u32 2147483647, %v1493_v13 }
 0x1ce   :  { %v477_v63 = vpop.xlane.xlu1 %476  ;;  %vm1586_vm1 = vcmp.eq.f32.partialorder %v634_v62, 8.507059e+37 }
 0x1cf   :  { %v520_v1 = vadd.f32 %v1470_v46, %v477_v63  ;;  %v613_v30 = vmul.f32 %v1489_v10, %v612_v21  ;;  %vm1614_vm7 = vcmp.eq.f32.partialorder %v649_v15, 8.507059e+37 }
 0x1d1   :  { %v971_v5 = vmul.f32 -1.442695, %v520_v1  ;;  %v1030_v11 = vpop.eup %1029  ;;  %v614_v40 = vadd.f32 %v1489_v10, %v613_v30 }
 0x1d2   :  { %v1498_v16 = vadd.f32 1.0, %v1030_v11  ;;  %v1576_v11 = vadd.s32 4294967264, %v1513_v32 }
 0x1d3   :  { %1031 = vpow2.f32 %v971_v5  ;;  %v618_v54 = vsel %vm1543_vm11, %v1489_v10, %v614_v40  ;;  %v636_v10 = vand.u32 2147483648, %v1486_v7 }
 0x1d4   :  { %1033 = vrcp.f32 %v1486_v7  ;;  %v623_v0 = vsel %vm620_vm13, %v622_v57, %v618_v54  ;;  %vm660_vm9 = vweird.f32 %v1498_v16  ;;  %v666_v47 = vand.u32 2147483648, %v1498_v16 }
 0x1d5   :  { %1035 = vrcp.f32 %v1493_v13 }
 0x1d6   :  { %v480_v3 = vpop.xlane.xlu2 %479  ;;  %v667_v62 = vor.u32 1.1754944e-38, %v666_v47 }
 0x1d7   :  { %v521_v9 = vadd.f32 %v1470_v46, %v480_v3 }
 0x1d9   :  { %v972_v14 = vmul.f32 -1.442695, %v521_v9  ;;  %v1032_v20 = vpop.eup %1031  ;;  %v853_v9 = vperm.slane %v608_v61, %v1513_v32 }
 0x1da   :  { %v1502_v23 = vpop.eup %1033  ;;  %v1506_v27 = vadd.f32 1.0, %v1032_v20 }
 0x1db   :  { %1037 = vpow2.f32 %v972_v14  ;;  %v1508_v28 = vpop.eup %1035  ;;  %v626_v8 = vmul.f32 %v1502_v23, %v1486_v7  ;;  %vm631_vm14 = vweird.f32 %v1502_v23  ;;  %v855_v14 = vperm.slane %v623_v0, %v854_v49 }
 0x1dc   :  { %1039 = vrcp.f32 %v1498_v16  ;;  %v641_v38 = vmul.f32 %v1508_v28, %v1493_v13  ;;  %vm1582_vm0 = vmor %vm630_vm15, %vm631_vm14  ;;  %vm646_vm2 = vweird.f32 %v1508_v28  ;;  %v679_v54 = vand.u32 2147483647, %v1506_v27 }
 0x1dd   :  { %v627_v41 = vsub.f32 1.0, %v626_v8  ;;  %vm1610_vm6 = vmor %vm645_vm4, %vm646_vm2  ;;  %vm675_vm14 = vweird.f32 %v1506_v27 }
 0x1de   :  { %v483_v17 = vpop.xlane.xlu1 %482  ;;  %v642_v26 = vsub.f32 1.0, %v641_v38 }
 0x1df   :  { %v522_v19 = vadd.f32 %v1470_v46, %v483_v17  ;;  %v628_v55 = vmul.f32 %v1502_v23, %v627_v41  ;;  %v651_v17 = vand.u32 2147483648, %v1493_v13 }
 0x1e0   :  { %v643_v1 = vmul.f32 %v1508_v28, %v642_v26  ;;  %v664_v26 = vand.u32 2147483647, %v1498_v16 }
 0x1e1   :  { %v973_v22 = vmul.f32 -1.442695, %v522_v19  ;;  %v1038_v31 = vpop.eup %1037  ;;  %v629_v3 = vadd.f32 %v1502_v23, %v628_v55  ;;  %v652_v13 = vor.u32 1.1754944e-38, %v651_v17  ;;  %v1650_v55 = vadd.s32 4294967240, %v1513_v32 }
 0x1e2   :  { %v1519_v36 = vpop.eup %1039  ;;  %v1527_v42 = vadd.f32 1.0, %v1038_v31  ;;  %v644_v7 = vadd.f32 %v1508_v28, %v643_v1  ;;  %v637_v31 = vor.u32 1.1754944e-38, %v636_v10  ;;  %vm665_vm13 = vcmp.eq.f32.partialorder %v664_v26, 8.507059e+37 }
 0x1e3   :  { %1041 = vpow2.f32 %v973_v22  ;;  %v656_v52 = vmul.f32 %v1519_v36, %v1498_v16  ;;  %v633_v22 = vsel %vm1582_vm0, %v1502_v23, %v629_v3  ;;  %vm661_vm8 = vweird.f32 %v1519_v36 }
 0x1e4   :  { %1043 = vrcp.f32 %v1506_v27  ;;  %v648_v40 = vsel %vm1610_vm6, %v1508_v28, %v644_v7  ;;  %vm1669_vm0 = vcmp.eq.f32.partialorder %v679_v54, 8.507059e+37  ;;  %v1674_v10 = vadd.s32 4294967232, %v1513_v32 }
 0x1e5   :  { %v657_v2 = vsub.f32 1.0, %v656_v52  ;;  %v653_v50 = vsel %vm1614_vm7, %v652_v13, %v648_v40  ;;  %v1642_v52 = vadd.s32 4294967248, %v1513_v32  ;;  %vm876_vm7 = vcmask 458112  }
 0x1e6   :  { %v486_v33 = vpop.xlane.xlu2 %485  ;;  %v863_v61 = vperm.slane %v653_v50, %v1562_v59 }
 0x1e7   :  { %v523_v35 = vadd.f32 %v1470_v46, %v486_v33  ;;  %v658_v20 = vmul.f32 %v1519_v36, %v657_v2  ;;  %v1603_v33 = vadd.s32 4294967256, %v1513_v32 }
 0x1e9   :  { %v1042_v39 = vpop.eup %1041  ;;  %v974_v43 = vmul.f32 -1.442695, %v523_v35  ;;  %v857_v35 = vsel %vm856_vm10, %v855_v14, %v853_v9  ;;  %v659_v41 = vadd.f32 %v1519_v36, %v658_v20  ;;  %vm1636_vm10 = vmor %vm660_vm9, %vm661_vm8 }
 0x1ea   :  { %v1549_v53 = vadd.f32 1.0, %v1042_v39  ;;  %v1556_v56 = vpop.eup %1043  ;;  %v638_v39 = vsel %vm1586_vm1, %v637_v31, %v633_v22  ;;  %vm872_vm1 = vcmask 392512  }
 0x1eb   :  { %1045 = vpow2.f32 %v974_v43  ;;  %v671_v4 = vmul.f32 %v1556_v56, %v1506_v27  ;;  %v859_v28 = vperm.slane %v638_v39, %v1559_v58  ;;  %v663_v29 = vsel %vm1636_vm10, %v1519_v36, %v659_v41 }
 0x1ec   :  { %1047 = vrcp.f32 %v1527_v42  ;;  %vm676_vm11 = vweird.f32 %v1556_v56  ;;  %v681_v36 = vand.u32 2147483648, %v1506_v27  ;;  %v709_v37 = vand.u32 2147483647, %v1549_v53 }
 0x1ed   :  { %1049 = vrcp.f32 %v1549_v53  ;;  %v672_v24 = vsub.f32 1.0, %v671_v4  ;;  %vm1665_vm15 = vmor %vm675_vm14, %vm676_vm11  ;;  %vm880_vm10 = vcmask 523712  }
 0x1ee   :  { %v489_v60 = vpop.xlane.xlu1 %488  ;;  %v682_v18 = vor.u32 1.1754944e-38, %v681_v36  ;;  %vm710_vm11 = vcmp.eq.f32.partialorder %v709_v37, 8.507059e+37 }
 0x1ef   :  { %v524_v63 = vadd.f32 %v1470_v46, %v489_v60  ;;  %v673_v44 = vmul.f32 %v1556_v56, %v672_v24  ;;  %v694_v24 = vand.u32 2147483647, %v1527_v42 }
 0x1f1   :  { %v975_v5 = vmul.f32 -1.442695, %v524_v63  ;;  %v1046_v6 = vpop.eup %1045  ;;  %v674_v58 = vadd.f32 %v1556_v56, %v673_v44  ;;  %vm695_vm8 = vcmp.eq.f32.partialorder %v694_v24, 8.507059e+37  ;;  %v1785_v24 = vadd.s32 4294967216, %v1513_v32 }
 0x1f2   :  { %v1578_v12 = vpop.eup %1047  ;;  %v1596_v25 = vadd.f32 1.0, %v1046_v6  ;;  %v668_v6 = vsel %vm665_vm13, %v667_v62, %v663_v29 }
 0x1f3   :  { %1051 = vpow2.f32 %v975_v5  ;;  %v1599_v8 = vpop.eup %1049  ;;  %v686_v34 = vmul.f32 %v1578_v12, %v1527_v42  ;;  %v861_v5 = vsel %vm860_vm3, %v859_v28, %v857_v35  ;;  %v678_v27 = vsel %vm1665_vm15, %v1556_v56, %v674_v58 }
 0x1f4   :  { %v498_v21 = vpop.xlane.xlu2 %497  ;;  %v701_v45 = vmul.f32 %v1599_v8, %v1549_v53  ;;  %1053 = vrcp.f32 %v1596_v25  ;;  %v865_v17 = vsel %vm864_vm5, %v863_v61, %v861_v5  ;;  %vm691_vm2 = vweird.f32 %v1578_v12 }
 0x1f5   :  { %v527_v30 = vadd.f32 %v1470_v46, %v498_v21  ;;  %v687_v48 = vsub.f32 1.0, %v686_v34  ;;  %vm690_vm3 = vweird.f32 %v1527_v42  ;;  %v867_v56 = vperm.slane %v668_v6, %v1576_v11 }
 0x1f6   :  { %v702_v60 = vsub.f32 1.0, %v701_v45  ;;  %v683_v22 = vsel %vm1669_vm0, %v682_v18, %v678_v27  ;;  %vm1695_vm4 = vmor %vm690_vm3, %vm691_vm2  ;;  %vm705_vm5 = vweird.f32 %v1549_v53  ;;  %vm706_vm6 = vweird.f32 %v1599_v8 }
 0x1f7   :  { %v978_v38 = vmul.f32 -1.442695, %v527_v30  ;;  %v688_v63 = vmul.f32 %v1578_v12, %v687_v48  ;;  %v696_v30 = vand.u32 2147483648, %v1527_v42  ;;  %v711_v42 = vand.u32 2147483648, %v1549_v53  ;;  %vm1717_vm9 = vmor %vm705_vm5, %vm706_vm6 }
 0x1f8   :  { %v703_v14 = vmul.f32 %v1599_v8, %v702_v60  ;;  %v871_v44 = vperm.slane %v683_v22, %v1603_v33  ;;  %v869_v28 = vsel %vm868_vm12, %v867_v56, %v865_v17  ;;  %v724_v33 = vand.u32 2147483647, %v1596_v25 }
 0x1f9   :  { %v1052_v43 = vpop.eup %1051  ;;  %1055 = vpow2.f32 %v978_v38  ;;  %v689_v19 = vadd.f32 %v1578_v12, %v688_v63  ;;  %v712_v26 = vor.u32 1.1754944e-38, %v711_v42  ;;  %vm720_vm12 = vweird.f32 %v1596_v25 }
 0x1fa   :  { %v1631_v49 = vadd.f32 1.0, %v1052_v43  ;;  %v1658_v1 = vpop.eup %1053  ;;  %v704_v35 = vadd.f32 %v1599_v8, %v703_v14  ;;  %v873_v58 = vsel %vm872_vm1, %v871_v44, %v869_v28  ;;  %vm1740_vm13 = vcmp.eq.f32.partialorder %v724_v33, 8.507059e+37 }
 0x1fb   :  { %v716_v20 = vmul.f32 %v1658_v1, %v1596_v25  ;;  %v693_v23 = vsel %vm1695_vm4, %v1578_v12, %v689_v19  ;;  %v697_v12 = vor.u32 1.1754944e-38, %v696_v30  ;;  %v726_v63 = vand.u32 2147483648, %v1596_v25 }
 0x1fc   :  { %v492_v57 = vpop.xlane.xlu2 %491  ;;  %1057 = vrcp.f32 %v1631_v49  ;;  %v708_v50 = vsel %vm1717_vm9, %v1599_v8, %v704_v35  ;;  %v1735_v8 = vadd.s32 4294967224, %v1513_v32  ;;  %vm721_vm14 = vweird.f32 %v1658_v1 }
 0x1fd   :  { %v525_v16 = vadd.f32 %v1470_v46, %v492_v57  ;;  %v717_v40 = vsub.f32 1.0, %v716_v20  ;;  %v698_v51 = vsel %vm695_vm8, %v697_v12, %v693_v23  ;;  %v713_v60 = vsel %vm710_vm11, %v712_v26, %v708_v50  ;;  %vm1768_vm0 = vmor %vm720_vm12, %vm721_vm14 }
 0x1fe   :  { %v495_v0 = vpop.xlane.xlu1 %494  ;;  %v875_v62 = vperm.slane %v698_v51, %v1642_v52  ;;  %v879_v5 = vperm.slane %v713_v60, %v1650_v55  ;;  %v1753_v6 = vadd.s32 4294967200, %v1513_v32  ;;  %v741_v9 = vand.u32 2147483648, %v1631_v49 }
 0x1ff   :  { %v976_v2 = vmul.f32 -1.442695, %v525_v16  ;;  %v526_v3 = vadd.f32 %v1470_v46, %v495_v0  ;;  %v1056_v4 = vpop.eup %1055  ;;  %v718_v29 = vmul.f32 %v1658_v1, %v717_v40  ;;  %vm735_vm15 = vweird.f32 %v1631_v49 }
 0x200   :  { %v1688_v21 = vadd.f32 1.0, %v1056_v4  ;;  %v877_v17 = vsel %vm876_vm7, %v875_v62, %v873_v58  ;;  %vm884_vm3 = vcmask 589312   ;;  %vm888_vm7 = vcmask 654912  }
 0x201   :  { %1059 = vpow2.f32 %v976_v2  ;;  %v977_v15 = vmul.f32 -1.442695, %v526_v3  ;;  %v739_v2 = vand.u32 2147483647, %v1631_v49  ;;  %v719_v52 = vadd.f32 %v1658_v1, %v718_v29 }
 0x202   :  { %v1683_v7 = vpop.eup %1057  ;;  %vm780_vm5 = vweird.f32 %v1688_v21  ;;  %v786_v40 = vand.u32 2147483648, %v1688_v21  ;;  %vm892_vm11 = vcmask 720512  }
 0x203   :  { %1061 = vpow2.f32 %v977_v15  ;;  %v731_v13 = vmul.f32 %v1683_v7, %v1631_v49  ;;  %v727_v15 = vor.u32 1.1754944e-38, %v726_v63  ;;  %vm736_vm1 = vweird.f32 %v1683_v7 }
 0x204   :  { %v504_v31 = vpop.xlane.xlu2 %503  ;;  %1063 = vrcp.f32 %v1688_v21  ;;  %vm1774_vm2 = vcmp.eq.f32.partialorder %v739_v2, 8.507059e+37  ;;  %v723_v25 = vsel %vm1768_vm0, %v1658_v1, %v719_v52  ;;  %vm1792_vm4 = vmor %vm735_vm15, %vm736_vm1  ;;  %v784_v1 = vand.u32 2147483647, %v1688_v21 }
 0x205   :  { %v529_v11 = vadd.f32 %v1470_v46, %v504_v31  ;;  %v732_v53 = vsub.f32 1.0, %v731_v13  ;;  %v742_v31 = vor.u32 1.1754944e-38, %v741_v9  ;;  %v1801_v13 = vadd.s32 4294967208, %v1513_v32 }
 0x206   :  { %v501_v38 = vpop.xlane.xlu1 %500  ;;  %vm1832_vm12 = vcmp.eq.f32.partialorder %v784_v1, 8.507059e+37  ;;  %v787_v63 = vor.u32 1.1754944e-38, %v786_v40  ;;  %vm896_vm1 = vcmask 786112   ;;  %v902_v9 = vadd.s32 4294967192, %v1513_v32 }
 0x207   :  { %v1060_v39 = vpop.eup %1059  ;;  %v980_v41 = vmul.f32 -1.442695, %v529_v11  ;;  %v528_v43 = vadd.f32 %v1470_v46, %v501_v38  ;;  %v733_v0 = vmul.f32 %v1683_v7, %v732_v53  ;;  %v881_v11 = vsel %vm880_vm10, %v879_v5, %v877_v17 }
 0x208   :  { %v1721_v47 = vadd.f32 1.0, %v1060_v39  ;;  %v728_v38 = vsel %vm1740_vm13, %v727_v15, %v723_v25 }
 0x209   :  { %v1062_v48 = vpop.eup %1061  ;;  %1065 = vpow2.f32 %v980_v41  ;;  %v979_v57 = vmul.f32 -1.442695, %v528_v43  ;;  %v734_v19 = vadd.f32 %v1683_v7, %v733_v0  ;;  %v883_v28 = vperm.slane %v728_v38, %v1674_v10 }
 0x20a   :  { %1067 = vrcp.f32 %v1721_v47  ;;  %v1730_v54 = vadd.f32 1.0, %v1062_v48  ;;  %v1737_v61 = vpop.eup %1063  ;;  %v756_v43 = vand.u32 2147483648, %v1721_v47  ;;  %vm750_vm8 = vweird.f32 %v1721_v47 }
 0x20b   :  { %v776_v27 = vmul.f32 %v1737_v61, %v1688_v21  ;;  %v738_v49 = vsel %vm1792_vm4, %v1683_v7, %v734_v19  ;;  %v754_v7 = vand.u32 2147483647, %v1721_v47  ;;  %vm781_vm14 = vweird.f32 %v1737_v61 }
 0x20c   :  { %v507_v16 = vpop.xlane.xlu0 %506  ;;  %1069 = vrcp.f32 %v1730_v54  ;;  %v743_v50 = vsel %vm1774_vm2, %v742_v31, %v738_v49  ;;  %v771_v53 = vand.u32 2147483648, %v1730_v54  ;;  %vm765_vm13 = vweird.f32 %v1730_v54  ;;  %vm1862_vm2 = vmor %vm780_vm5, %vm781_vm14 }
 0x20d   :  { %1071 = vpow2.f32 %v979_v57  ;;  %v530_v3 = vadd.f32 %v1470_v46, %v507_v16  ;;  %v777_v34 = vsub.f32 1.0, %v776_v27  ;;  %v757_v57 = vor.u32 1.1754944e-38, %v756_v43 }
 0x20e   :  { %v769_v58 = vand.u32 2147483647, %v1730_v54  ;;  %vm755_vm15 = vcmp.eq.f32.partialorder %v754_v7, 8.507059e+37  ;;  %v887_v2 = vperm.slane %v743_v50, %v1735_v8  ;;  %v906_v27 = vadd.s32 4294967184, %v1513_v32 }
 0x20f   :  { %v1066_v4 = vpop.eup %1065  ;;  %v981_v46 = vmul.f32 -1.442695, %v530_v3  ;;  %v778_v12 = vmul.f32 %v1737_v61, %v777_v34  ;;  %v772_v3 = vor.u32 1.1754944e-38, %v771_v53  ;;  %vm904_vm14 = vcmask 917312  }
 0x210   :  { %v1755_v59 = vpop.eup %1067  ;;  %v1760_v14 = vadd.f32 1.0, %v1066_v4  ;;  %vm770_vm4 = vcmp.eq.f32.partialorder %v769_v58, 8.507059e+37 }
 0x211   :  { %v746_v55 = vmul.f32 %v1755_v59, %v1721_v47  ;;  %vm751_vm6 = vweird.f32 %v1755_v59  ;;  %v779_v16 = vadd.f32 %v1737_v61, %v778_v12 }
 0x212   :  { %1073 = vrcp.f32 %v1760_v14  ;;  %v1779_v56 = vpop.eup %1069  ;;  %vm1825_vm9 = vmor %vm750_vm8, %vm751_vm6  ;;  %vm900_vm6 = vcmask 851712   ;;  %vm810_vm8 = vweird.f32 %v1760_v14  ;;  %v814_v34 = vand.u32 2147483647, %v1760_v14 }
 0x213   :  { %v747_v22 = vsub.f32 1.0, %v746_v55  ;;  %1075 = vpow2.f32 %v981_v46  ;;  %v1072_v30 = vpop.eup %1071  ;;  %v761_v35 = vmul.f32 %v1779_v56, %v1730_v54  ;;  %vm766_vm10 = vweird.f32 %v1779_v56 }
 0x214   :  { %v1798_v42 = vadd.f32 1.0, %v1072_v30  ;;  %vm1849_vm0 = vmor %vm765_vm13, %vm766_vm10  ;;  %v783_v15 = vsel %vm1862_vm2, %v1737_v61, %v779_v16  ;;  %v816_v55 = vand.u32 2147483648, %v1760_v14 }
 0x215   :  { %v748_v37 = vmul.f32 %v1755_v59, %v747_v22  ;;  %v762_v39 = vsub.f32 1.0, %v761_v35  ;;  %v788_v22 = vsel %vm1832_vm12, %v787_v63, %v783_v15 }
 0x216   :  { %1077 = vrcp.f32 %v1798_v42  ;;  %v799_v17 = vand.u32 2147483647, %v1798_v42  ;;  %v801_v18 = vand.u32 2147483648, %v1798_v42  ;;  %v817_v1 = vor.u32 1.1754944e-38, %v816_v55 }
 0x217   :  { %v749_v41 = vadd.f32 %v1755_v59, %v748_v37  ;;  %v763_v45 = vmul.f32 %v1779_v56, %v762_v39  ;;  %v899_v40 = vperm.slane %v788_v22, %v1753_v6 }
 0x218   :  { %v1814_v44 = vpop.eup %1073  ;;  %vm800_vm13 = vcmp.eq.f32.partialorder %v799_v17, 8.507059e+37 }
 0x219   :  { %v1076_v48 = vpop.eup %1075  ;;  %v806_v51 = vmul.f32 %v1814_v44, %v1760_v14  ;;  %v753_v10 = vsel %vm1825_vm9, %v1755_v59, %v749_v41  ;;  %v764_v26 = vadd.f32 %v1779_v56, %v763_v45  ;;  %v885_v59 = vsel %vm884_vm3, %v883_v28, %v881_v11 }
 0x21a   :  { %v1841_v29 = vadd.f32 1.0, %v1076_v48  ;;  %v758_v0 = vsel %vm755_vm15, %v757_v57, %v753_v10  ;;  %vm811_vm3 = vweird.f32 %v1814_v44  ;;  %v889_v25 = vsel %vm888_vm7, %v887_v2, %v885_v59 }
 0x21b   :  { %v807_v60 = vsub.f32 1.0, %v806_v51  ;;  %v768_v54 = vsel %vm1849_vm0, %v1779_v56, %v764_v26  ;;  %v891_v21 = vperm.slane %v758_v0, %v1785_v24  ;;  %vm795_vm9 = vweird.f32 %v1798_v42  ;;  %vm1885_vm10 = vmor %vm810_vm8, %vm811_vm3 }
 0x21c   :  { %1079 = vrcp.f32 %v1841_v29  ;;  %v1078_v36 = vpop.eup %1077  ;;  %v773_v46 = vsel %vm770_vm4, %v772_v3, %v768_v54  ;;  %v802_v11 = vor.u32 1.1754944e-38, %v801_v18  ;;  %v831_v38 = vand.u32 2147483648, %v1841_v29 }
 0x21d   :  { %v808_v4 = vmul.f32 %v1814_v44, %v807_v60  ;;  %v791_v5 = vmul.f32 %v1078_v36, %v1798_v42  ;;  %vm796_vm5 = vweird.f32 %v1078_v36  ;;  %v895_v24 = vperm.slane %v773_v46, %v1801_v13 }
 0x21e   :  { %v893_v35 = vsel %vm892_vm11, %v891_v21, %v889_v25  ;;  %vm797_vm7 = vmor %vm795_vm9, %vm796_vm5  ;;  %v829_v42 = vand.u32 2147483647, %v1841_v29  ;;  %vm815_vm11 = vcmp.eq.f32.partialorder %v814_v34, 8.507059e+37  ;;  %vm825_vm15 = vweird.f32 %v1841_v29 }
 0x21f   :  { %v792_v8 = vsub.f32 1.0, %v791_v5  ;;  %v809_v56 = vadd.f32 %v1814_v44, %v808_v4  ;;  %v897_v14 = vsel %vm896_vm1, %v895_v24, %v893_v35  ;;  %v832_v7 = vor.u32 1.1754944e-38, %v831_v38 }
 0x220   :  { %v901_v45 = vsel %vm900_vm6, %v899_v40, %v897_v14  ;;  %vm830_vm2 = vcmp.eq.f32.partialorder %v829_v42, 8.507059e+37  ;;  %vm908_vm4 = vcmask 982912   ;;  %vm912_vm1 = vcmask 1048512  }
 0x221   :  { %v793_v20 = vmul.f32 %v1078_v36, %v792_v8  ;;  %v813_v13 = vsel %vm1885_vm10, %v1814_v44, %v809_v56  ;;  %v910_v44 = vadd.s32 4294967176, %v1513_v32 }
 0x222   :  { %v1080_v19 = vpop.eup %1079  ;;  %v818_v43 = vsel %vm815_vm11, %v817_v1, %v813_v13 }
 0x223   :  { %v821_v61 = vmul.f32 %v1080_v19, %v1841_v29  ;;  %v794_v30 = vadd.f32 %v1078_v36, %v793_v20  ;;  %vm826_vm12 = vweird.f32 %v1080_v19  ;;  %v907_v50 = vperm.slane %v818_v43, %v906_v27 }
 0x224   :  { %vm827_vm0 = vmor %vm825_vm15, %vm826_vm12 }
 0x225   :  { %v822_v23 = vsub.f32 1.0, %v821_v61  ;;  %v798_v37 = vsel %vm797_vm7, %v1078_v36, %v794_v30 }
 0x226   :  { %v803_v49 = vsel %vm800_vm13, %v802_v11, %v798_v37 }
 0x227   :  { %v823_v39 = vmul.f32 %v1080_v19, %v822_v23  ;;  %v903_v41 = vperm.slane %v803_v49, %v902_v9 }
 0x229   :  { %v824_v12 = vadd.f32 %v1080_v19, %v823_v39  ;;  %v905_v28 = vsel %vm904_vm14, %v903_v41, %v901_v45 }
 0x22a   :  { %v909_v51 = vsel %vm908_vm4, %v907_v50, %v905_v28 }
 0x22b   :  { %v828_v48 = vsel %vm827_vm0, %v1080_v19, %v824_v12 }
 0x22c   :  { %v833_v6 = vsel %vm830_vm2, %v832_v7, %v828_v48 }
 0x22d   :  { %v911_v33 = vperm.slane %v833_v6, %v910_v44 }
 0x22f   :  { %v913_v32 = vsel %vm912_vm1, %v911_v33, %v909_v51 }
 0x230   :  { %915 = vst [vmem:[#allocation3] sm:$0x1] %v913_v32 }
 0x231   :  { %926 = dma.vmem_to_hbm [thread:$0]  %s922_s5, 16, %s924_s21, [#allocation4]  }
 0x232   :  { %1105 = dma.done.wait [#allocation4], 16  }
 0x233   :  { %1106 = vsyncadd [#allocation4], 4294967280 }
 0x234   :  { %931 = vsyncpa [#allocation4], 1 }

</bundles_post_ra>
